<compile_context>
chip_gen: v7x
topology: tpu7x:2x2x1
jax: 0.10.0
libtpu: 0.0.40
codegen_flags: <defaults>
</compile_context>

<pallas_src>
import functools
import math

import jax
import jax.numpy as jnp
from jax.experimental import pallas as pl
from jax.experimental.pallas import tpu as pltpu


def _mha_kernel(xq_ref, xk_ref, xv_ref, wqkv_ref, wo_ref, o_ref,
                *, n_heads, inv_scale):
    # xq/xk/xv_ref : (S, D) bf16 activation block for one batch element
    # wqkv_ref     : (3H, D, d_k) bf16 fused, head-split Q|K|V weights
    # wo_ref       : (H, d_k, D) bf16 head-split output-projection weights
    # o_ref        : (S, D) f32 output block
    H = n_heads
    S, D = xq_ref.shape

    # Head-batched activations: broadcast each input across heads and stack the
    # Q/K/V streams on the (major) batch axis -> one fused projection matmul.
    xb = jnp.concatenate(
        [jnp.broadcast_to(xq_ref[...][None], (H, S, D)),
         jnp.broadcast_to(xk_ref[...][None], (H, S, D)),
         jnp.broadcast_to(xv_ref[...][None], (H, S, D))],
        axis=0)                                                  # (3H, S, D) bf16

    # Fused Q/K/V projection: single batched MXU matmul, bf16 in / f32 accumulate.
    qkv = jnp.einsum("hsd,hdk->hsk", xb, wqkv_ref[...],
                     preferred_element_type=jnp.float32)         # (3H, S, d_k) f32

    q = qkv[0:H] * inv_scale          # scale Q once (not every (S,S) score tile)
    k = qkv[H:2 * H]
    v = qkv[2 * H:3 * H]

    # Per-head attention scores, batched over heads.  The K transpose is
    # absorbed into the contraction (no explicit kh.T / XLU relayout).
    scores = jnp.einsum("hqd,hkd->hqk",
                        q.astype(jnp.bfloat16), k.astype(jnp.bfloat16),
                        preferred_element_type=jnp.float32)      # (H, S, S) f32

    # TODO(synk): the reference module's mask branch references an undefined
    # name (`attn_scores`) and only works with mask=None, so no mask handling.

    # Numerically-stable softmax in f32; reciprocal on the (otherwise idle) EUP.
    m = jnp.max(scores, axis=-1, keepdims=True)
    e = jnp.exp(scores - m)
    p = e * pl.reciprocal(jnp.sum(e, axis=-1, keepdims=True), approx=True)

    # Attention-weighted values, batched over heads.
    ctx = jnp.einsum("hqk,hkd->hqd",
                     p.astype(jnp.bfloat16), v.astype(jnp.bfloat16),
                     preferred_element_type=jnp.float32)         # (H, S, d_k) f32

    # Output projection accumulated per head (wo pre-split into (H, d_k, D)):
    # no lane-axis concatenate of d_k-wide head chunks.
    out_h = jnp.einsum("hqd,hdo->hqo",
                       ctx.astype(jnp.bfloat16), wo_ref[...],
                       preferred_element_type=jnp.float32)       # (H, S, D) f32
    o_ref[...] = jnp.sum(out_h, axis=0).astype(o_ref.dtype)


def mha_forward(Q, K, V, mask, params, *, n_heads):
    """Pallas MHA forward. mask must be None (see TODO in kernel)."""
    assert mask is None
    B, S, D = Q.shape
    d_k = D // n_heads
    inv_scale = 1.0 / math.sqrt(float(d_k))

    # PyTorch Linear weight is (out, in); y = x @ W.T.  Pre-split per head in
    # the wrapper (free, outside the kernel) into head-major batched weights.
    def head_major(w):                      # -> (H, D_in, d_k)
        return jnp.transpose(w.T.reshape(D, n_heads, d_k), (1, 0, 2))

    wqkv = jnp.concatenate([head_major(params["w_q"]),
                            head_major(params["w_k"]),
                            head_major(params["w_v"])],
                           axis=0).astype(jnp.bfloat16)          # (3H, D, d_k)
    wo = params["w_o"].T.reshape(n_heads, d_k, D).astype(jnp.bfloat16)  # (H, d_k, D)

    qb = Q.astype(jnp.bfloat16)
    kb = K.astype(jnp.bfloat16)
    vb = V.astype(jnp.bfloat16)

    kernel = functools.partial(_mha_kernel, n_heads=n_heads, inv_scale=inv_scale)

    act_spec = pl.BlockSpec((None, S, D), lambda b: (b, 0, 0))
    wqkv_spec = pl.BlockSpec((3 * n_heads, D, d_k), lambda b: (0, 0, 0))
    wo_spec = pl.BlockSpec((n_heads, d_k, D), lambda b: (0, 0, 0))

    return pl.pallas_call(
        kernel,
        out_shape=jax.ShapeDtypeStruct((B, S, D), Q.dtype),
        grid_spec=pltpu.PrefetchScalarGridSpec(
            num_scalar_prefetch=0,
            grid=(B,),
            in_specs=[act_spec, act_spec, act_spec, wqkv_spec, wo_spec],
            out_specs=act_spec,
        ),
        compiler_params=pltpu.CompilerParams(
            dimension_semantics=("parallel",)),
    )(qb, kb, vb, wqkv, wo)


def _mha_reference(Q, K, V, params, n_heads):
    """Pure-JAX f32 reference mirroring the PyTorch module (mask=None)."""
    B, S, D = Q.shape
    d_k = D // n_heads
    scale = jnp.sqrt(jnp.float32(d_k))

    def lin(x, w):  # PyTorch Linear without bias: x @ w.T
        return jnp.einsum("bsd,od->bso", x, w)

    q = lin(Q, params["w_q"]).reshape(B, S, n_heads, d_k).transpose(0, 2, 1, 3)
    k = lin(K, params["w_k"]).reshape(B, S, n_heads, d_k).transpose(0, 2, 1, 3)
    v = lin(V, params["w_v"]).reshape(B, S, n_heads, d_k).transpose(0, 2, 1, 3)

    scores = jnp.einsum("bhqd,bhkd->bhqk", q, k) / scale
    w = jax.nn.softmax(scores, axis=-1)
    out = jnp.einsum("bhqk,bhkd->bhqd", w, v)
    out = out.transpose(0, 2, 1, 3).reshape(B, S, D)
    return lin(out, params["w_o"])


if __name__ == "__main__":
    # Small shapes consistent with the module's forward.
    batch, seq, d_model, n_heads = 2, 8, 32, 4

    key = jax.random.PRNGKey(0)
    kq, kk, kv, k1, k2, k3, k4 = jax.random.split(key, 7)

    Q = jax.random.normal(kq, (batch, seq, d_model), dtype=jnp.float32)
    K = jax.random.normal(kk, (batch, seq, d_model), dtype=jnp.float32)
    V = jax.random.normal(kv, (batch, seq, d_model), dtype=jnp.float32)

    # Deterministic parameter init (PyTorch Linear weight shape: (out, in)).
    bound = 1.0 / jnp.sqrt(jnp.float32(d_model))
    params = {
        "w_q": jax.random.uniform(k1, (d_model, d_model), jnp.float32, -bound, bound),
        "w_k": jax.random.uniform(k2, (d_model, d_model), jnp.float32, -bound, bound),
        "w_v": jax.random.uniform(k3, (d_model, d_model), jnp.float32, -bound, bound),
        "w_o": jax.random.uniform(k4, (d_model, d_model), jnp.float32, -bound, bound),
    }

    out = mha_forward(Q, K, V, None, params, n_heads=n_heads)
    out = jax.block_until_ready(out)

    ref = _mha_reference(Q, K, V, params, n_heads)
    assert out.shape == (batch, seq, d_model)
    # bf16 matmul operands (f32 accumulation / f32 softmax) => looser tolerance
    # than the pure-f32 path.
    assert jnp.allclose(out, ref, atol=3e-2, rtol=3e-2), "mismatch vs JAX reference"

    print("KERNEL_OK")
</pallas_src>

<mosaic_0001>
module attributes {stable_mosaic.version = 11 : i64} {
  func.func @_mha_kernel(%arg0: i32, %arg1: memref<1x8x32xbf16, #tpu.memory_space<vmem>>, %arg2: memref<1x8x32xbf16, #tpu.memory_space<vmem>>, %arg3: memref<1x8x32xbf16, #tpu.memory_space<vmem>>, %arg4: memref<12x32x8xbf16, #tpu.memory_space<vmem>>, %arg5: memref<4x8x32xbf16, #tpu.memory_space<vmem>>, %arg6: memref<1x8x32xf32, #tpu.memory_space<vmem>>) attributes {dimension_semantics = [#tpu.dimension_semantics<parallel>], iteration_bounds = array<i64: 2>, scalar_prefetch = 0 : i64, scratch_operands = 0 : i64, tpu.core_type = #tpu.core_type<tc>, window_params = [{transform_indices = @transform_0, window_bounds = array<i64: 1, 8, 32>}, {transform_indices = @transform_1, window_bounds = array<i64: 1, 8, 32>}, {transform_indices = @transform_2, window_bounds = array<i64: 1, 8, 32>}, {pipeline_mode = #tpu.pipeline_mode<synchronous>, transform_indices = @transform_3, window_bounds = array<i64: 12, 32, 8>}, {pipeline_mode = #tpu.pipeline_mode<synchronous>, transform_indices = @transform_4, window_bounds = array<i64: 4, 8, 32>}, {transform_indices = @transform_5, window_bounds = array<i64: 1, 8, 32>}]} {
    %c0 = arith.constant 0 : index
    %c0_0 = arith.constant 0 : index
    %c0_1 = arith.constant 0 : index
    %0 = vector.load %arg1[%c0, %c0_0, %c0_1] : memref<1x8x32xbf16, #tpu.memory_space<vmem>>, vector<1x8x32xbf16>
    %1 = vector.shape_cast %0 : vector<1x8x32xbf16> to vector<8x32xbf16>
    %2 = vector.shape_cast %1 : vector<8x32xbf16> to vector<1x8x32xbf16>
    %3 = vector.shape_cast %2 : vector<1x8x32xbf16> to vector<1x8x32xbf16>
    %4 = vector.broadcast %3 : vector<1x8x32xbf16> to vector<4x8x32xbf16>
    %c0_2 = arith.constant 0 : index
    %c0_3 = arith.constant 0 : index
    %c0_4 = arith.constant 0 : index
    %5 = vector.load %arg2[%c0_2, %c0_3, %c0_4] : memref<1x8x32xbf16, #tpu.memory_space<vmem>>, vector<1x8x32xbf16>
    %6 = vector.shape_cast %5 : vector<1x8x32xbf16> to vector<8x32xbf16>
    %7 = vector.shape_cast %6 : vector<8x32xbf16> to vector<1x8x32xbf16>
    %8 = vector.shape_cast %7 : vector<1x8x32xbf16> to vector<1x8x32xbf16>
    %9 = vector.broadcast %8 : vector<1x8x32xbf16> to vector<4x8x32xbf16>
    %c0_5 = arith.constant 0 : index
    %c0_6 = arith.constant 0 : index
    %c0_7 = arith.constant 0 : index
    %10 = vector.load %arg3[%c0_5, %c0_6, %c0_7] : memref<1x8x32xbf16, #tpu.memory_space<vmem>>, vector<1x8x32xbf16>
    %11 = vector.shape_cast %10 : vector<1x8x32xbf16> to vector<8x32xbf16>
    %12 = vector.shape_cast %11 : vector<8x32xbf16> to vector<1x8x32xbf16>
    %13 = vector.shape_cast %12 : vector<1x8x32xbf16> to vector<1x8x32xbf16>
    %14 = vector.broadcast %13 : vector<1x8x32xbf16> to vector<4x8x32xbf16>
    %15 = tpu.concatenate %4, %9, %14 in 0 : vector<4x8x32xbf16>, vector<4x8x32xbf16>, vector<4x8x32xbf16> -> vector<12x8x32xbf16>
    %c0_8 = arith.constant 0 : index
    %c0_9 = arith.constant 0 : index
    %c0_10 = arith.constant 0 : index
    %16 = vector.load %arg4[%c0_8, %c0_9, %c0_10] : memref<12x32x8xbf16, #tpu.memory_space<vmem>>, vector<12x32x8xbf16>
    "tpu.trace_start"() <{level = 10 : i32, message = "hsd,hdk->hsk"}> : () -> ()
    %cst = arith.constant dense<0.000000e+00> : vector<12x8x8xf32>
    %17 = tpu.matmul %15, %16, %cst {dimension_numbers = #tpu.dot_dimension_numbers<[2], [1], [1], [2], [0, 0, 0, 1, 1, 2], [0], [0]>} : vector<12x8x32xbf16>, vector<12x32x8xbf16>, vector<12x8x8xf32> -> vector<12x8x8xf32>
    "tpu.trace_stop"() : () -> ()
    %18 = vector.extract_strided_slice %17 {offsets = [0, 0, 0], sizes = [4, 8, 8], strides = [1, 1, 1]} : vector<12x8x8xf32> to vector<4x8x8xf32>
    %cst_11 = arith.constant 0.353553385 : f32
    %19 = vector.broadcast %cst_11 : f32 to vector<4x8x8xf32>
    %20 = arith.mulf %18, %19 : vector<4x8x8xf32>
    %21 = vector.extract_strided_slice %17 {offsets = [4, 0, 0], sizes = [4, 8, 8], strides = [1, 1, 1]} : vector<12x8x8xf32> to vector<4x8x8xf32>
    %22 = vector.extract_strided_slice %17 {offsets = [8, 0, 0], sizes = [4, 8, 8], strides = [1, 1, 1]} : vector<12x8x8xf32> to vector<4x8x8xf32>
    %23 = arith.truncf %20 : vector<4x8x8xf32> to vector<4x8x8xbf16>
    %24 = arith.truncf %21 : vector<4x8x8xf32> to vector<4x8x8xbf16>
    "tpu.trace_start"() <{level = 10 : i32, message = "hqd,hkd->hqk"}> : () -> ()
    %cst_12 = arith.constant dense<0.000000e+00> : vector<4x8x8xf32>
    %25 = tpu.matmul %23, %24, %cst_12 {dimension_numbers = #tpu.dot_dimension_numbers<[2], [2], [1], [1], [0, 0, 0, 1, 1, 1], [0], [0]>} : vector<4x8x8xbf16>, vector<4x8x8xbf16>, vector<4x8x8xf32> -> vector<4x8x8xf32>
    "tpu.trace_stop"() : () -> ()
    %cst_13 = arith.constant dense<0xFF800000> : vector<4x8xf32>
    %26 = vector.multi_reduction <maximumf>, %25, %cst_13 [2] : vector<4x8x8xf32> to vector<4x8xf32>
    %27 = vector.shape_cast %26 : vector<4x8xf32> to vector<4x8x1xf32>
    %28 = vector.broadcast %27 : vector<4x8x1xf32> to vector<4x8x8xf32>
    %29 = arith.subf %25, %28 : vector<4x8x8xf32>
    %30 = math.exp %29 : vector<4x8x8xf32>
    %cst_14 = arith.constant dense<0.000000e+00> : vector<4x8xf32>
    %31 = vector.multi_reduction <add>, %30, %cst_14 [2] : vector<4x8x8xf32> to vector<4x8xf32>
    %32 = vector.shape_cast %31 : vector<4x8xf32> to vector<4x8x1xf32>
    %33 = tpu.reciprocal %32 {approx = true} : vector<4x8x1xf32> -> vector<4x8x1xf32>
    %34 = vector.broadcast %33 : vector<4x8x1xf32> to vector<4x8x8xf32>
    %35 = arith.mulf %30, %34 : vector<4x8x8xf32>
    %36 = arith.truncf %35 : vector<4x8x8xf32> to vector<4x8x8xbf16>
    %37 = arith.truncf %22 : vector<4x8x8xf32> to vector<4x8x8xbf16>
    "tpu.trace_start"() <{level = 10 : i32, message = "hqk,hkd->hqd"}> : () -> ()
    %cst_15 = arith.constant dense<0.000000e+00> : vector<4x8x8xf32>
    %38 = tpu.matmul %36, %37, %cst_15 {dimension_numbers = #tpu.dot_dimension_numbers<[2], [1], [1], [2], [0, 0, 0, 1, 1, 2], [0], [0]>} : vector<4x8x8xbf16>, vector<4x8x8xbf16>, vector<4x8x8xf32> -> vector<4x8x8xf32>
    "tpu.trace_stop"() : () -> ()
    %39 = arith.truncf %38 : vector<4x8x8xf32> to vector<4x8x8xbf16>
    %c0_16 = arith.constant 0 : index
    %c0_17 = arith.constant 0 : index
    %c0_18 = arith.constant 0 : index
    %40 = vector.load %arg5[%c0_16, %c0_17, %c0_18] : memref<4x8x32xbf16, #tpu.memory_space<vmem>>, vector<4x8x32xbf16>
    "tpu.trace_start"() <{level = 10 : i32, message = "hqd,hdo->hqo"}> : () -> ()
    %cst_19 = arith.constant dense<0.000000e+00> : vector<4x8x32xf32>
    %41 = tpu.matmul %39, %40, %cst_19 {dimension_numbers = #tpu.dot_dimension_numbers<[2], [1], [1], [2], [0, 0, 0, 1, 1, 2], [0], [0]>} : vector<4x8x8xbf16>, vector<4x8x32xbf16>, vector<4x8x32xf32> -> vector<4x8x32xf32>
    "tpu.trace_stop"() : () -> ()
    %cst_20 = arith.constant dense<0.000000e+00> : vector<8x32xf32>
    %42 = vector.multi_reduction <add>, %41, %cst_20 [0] : vector<4x8x32xf32> to vector<8x32xf32>
    %c0_21 = arith.constant 0 : index
    %c0_22 = arith.constant 0 : index
    %c0_23 = arith.constant 0 : index
    %43 = vector.load %arg6[%c0_21, %c0_22, %c0_23] : memref<1x8x32xf32, #tpu.memory_space<vmem>>, vector<1x8x32xf32>
    %44 = vector.shape_cast %43 : vector<1x8x32xf32> to vector<8x32xf32>
    %45 = vector.shape_cast %42 : vector<8x32xf32> to vector<1x8x32xf32>
    tpu.vector_store %arg6[%c0_21, %c0_22, %c0_23], %45 {strides = array<i32>} : memref<1x8x32xf32, #tpu.memory_space<vmem>>, vector<1x8x32xf32>,
    return
  }
  func.func @transform_0(%arg0: i32) -> (i32, i32, i32) {
    %c0_i32 = arith.constant 0 : i32
    %c0_i32_0 = arith.constant 0 : i32
    %c0_i32_1 = arith.constant 0 : i32
    return %arg0, %c0_i32, %c0_i32_0 : i32, i32, i32
  }
  func.func @transform_1(%arg0: i32) -> (i32, i32, i32) {
    %c0_i32 = arith.constant 0 : i32
    %c0_i32_0 = arith.constant 0 : i32
    %c0_i32_1 = arith.constant 0 : i32
    return %arg0, %c0_i32, %c0_i32_0 : i32, i32, i32
  }
  func.func @transform_2(%arg0: i32) -> (i32, i32, i32) {
    %c0_i32 = arith.constant 0 : i32
    %c0_i32_0 = arith.constant 0 : i32
    %c0_i32_1 = arith.constant 0 : i32
    return %arg0, %c0_i32, %c0_i32_0 : i32, i32, i32
  }
  func.func @transform_3(%arg0: i32) -> (i32, i32, i32) {
    %c0_i32 = arith.constant 0 : i32
    %c0_i32_0 = arith.constant 0 : i32
    %c0_i32_1 = arith.constant 0 : i32
    %c0_i32_2 = arith.constant 0 : i32
    return %c0_i32, %c0_i32_0, %c0_i32_1 : i32, i32, i32
  }
  func.func @transform_4(%arg0: i32) -> (i32, i32, i32) {
    %c0_i32 = arith.constant 0 : i32
    %c0_i32_0 = arith.constant 0 : i32
    %c0_i32_1 = arith.constant 0 : i32
    %c0_i32_2 = arith.constant 0 : i32
    return %c0_i32, %c0_i32_0, %c0_i32_1 : i32, i32, i32
  }
  func.func @transform_5(%arg0: i32) -> (i32, i32, i32) {
    %c0_i32 = arith.constant 0 : i32
    %c0_i32_0 = arith.constant 0 : i32
    %c0_i32_1 = arith.constant 0 : i32
    return %arg0, %c0_i32, %c0_i32_0 : i32, i32, i32
  }
}

</mosaic_0001>

<bundles_post_ra>
// kernel: tpu_custom_call.1
= control target key start
LH: loop header
LB: loop body
LE: loop exit
PB: predicated region body
PF: predicated region fallthrough
CT: control target
= control target key end

     0   :  { %10 = vsyncpa [#allocation3], 0  ;;  %s2473_s0 = inlined_call_operand.vmem [shape: bf16[2,8,32], index: 0, kind: input, shape index: {}]   ;;  %s2474_s1 = inlined_call_operand.vmem [shape: bf16[2,8,32], index: 1, kind: input, shape index: {}]   ;;  %s2475_s2 = inlined_call_operand.vmem [shape: bf16[2,8,32], index: 2, kind: input, shape index: {}]   ;;  %s2476_s3 = inlined_call_operand.vmem [shape: bf16[12,32,8], index: 3, kind: input, shape index: {}]   ;;  %s2477_s4 = inlined_call_operand.vmem [shape: bf16[4,8,32], index: 4, kind: input, shape index: {}]   ;;  %s2478_s5 = inlined_call_operand.hbm [shape: f32[2,8,32], index: 5, kind: output, shape index: {}]  }
   0x1   :  { %12 = vsyncpa [#allocation3 + $0x1], 0  ;;  %s2137_s18 = smov 0   ;;  %s2139_s19 = smov 0  }
   0x2   :  { %s2141_s20 = smov 0   ;;  %s2143_s21 = smov 0  }
   0x3 LB: > { %s2158_s22 = sadd.s32 4294967295, %s2102_s21   ;;  %s1671_s23 = sadd.s32 4294967294, %s2102_s21   ;;  %s2102_s21 = sphi %s2143_s21, %s2484_s21   ;;  %s2098_s20 = sphi %s2141_s20, %s2483_s20   ;;  %s2094_s19 = sphi %s2139_s19, %s2482_s19   ;;  %s2090_s18 = sphi %s2137_s18, %s2481_s18  }
   0x4   : > { %s2162_s24 = sadd.s32 1, %s2102_s21   ;;  %s145_s25 = sadd.s32 1, %s2098_s20 }
   0x5   : > { %s142_s26 = ssub.s32 %s2102_s21, %s2162_s24  ;;  %p155_p0 = scmp.ne.s32.totalorder %s2098_s20, %s2094_s19 }
   0x6   : > { %p143_p1 = scmp.eq.s32.totalorder %s142_s26, 0  ;;  %p156_p2 = scmp.eq.s32.totalorder %s2158_s22, 1 }
   0x7   : > { %p161_p3 = scmp.ne.s32.totalorder %s2094_s19, %s2090_s18  ;;  %p162_p4 = scmp.eq.s32.totalorder %s1671_s23, 1 }
   0x8   : > { %s2173_s27 = scalar_select %p143_p1, %s2098_s20, %s145_s25  }
   0x9   : > { %p2175_p5 = por %p156_p2, %p155_p0  ;;  %p2179_p6 = por %p162_p4, %p161_p3 }
   0xa   : > { %p1674_p7 = scmp.ge.s32.totalorder %s2102_s21, 1  ;;  %p207_p8 = scmp.lt.s32.totalorder %s2102_s21, 3 }
   0xc   : > { %p208_p9 = pnand %p1674_p7, %p207_p8 }
   0xd   : > { %v2000_v0 = vld [vmem:[%s2476_s3] sm:$0xff] (!%p208_p9)   ;;  %v2104_v1 = vmov (!%p208_p9), 0.0   ;;  %v2001_v2 = vld [vmem:[%s2476_s3 + $0x10] sm:$0xff] (!%p208_p9)   ;;  %v2002_v3 = vld [vmem:[%s2476_s3 + $0x8] sm:$0xff] (!%p208_p9)   ;;  %vm2105_vm0 = vmmov (!%p208_p9), 0   ;;  %p242_p10 = scmp.lt.s32.totalorder (!%p208_p9), %s2158_s22, 1 }
   0xe   : > { %211 = sbr.rel (%p208_p9) target bundleno = 1247 (0x4df), region = 40  ;;  %1791 = vmatprep.subr.bf16.mxu0 (!%p208_p9), %v2104_v1  ;;  %1799 = vmatprep.subr.bf16.mxu1 (!%p208_p9), %v2104_v1  ;;  %v2003_v4 = vld [vmem:[%s2476_s3 + $0x18] sm:$0xff] (!%p208_p9)   ;;  %vm318_vm1 = vcmask (!%p208_p9), 261120   ;;  %v2004_v5 = vld [vmem:[%s2476_s3 + $0x20] sm:$0xff] (!%p208_p9)   ;;  %v2005_v6 = vld [vmem:[%s2476_s3 + $0x30] sm:$0xff] (!%p208_p9)   ;;  %vm952_vm2 = vcmask (!%p208_p9), 64512  }
   0xf   : > { %1792 = vmatpush3.bf16.msra.mxu0 (!%p208_p9), %v2000_v0  ;;  %1795 = vmatprep.mubr.msk.bf16.mxu0 (!%p208_p9), %vm2105_vm0, %v2104_v1  ;;  %v2006_v8 = vld [vmem:[%s2476_s3 + $0x28] sm:$0xff] (!%p208_p9)   ;;  %v2007_v9 = vld [vmem:[%s2476_s3 + $0x38] sm:$0xff] (!%p208_p9)   ;;  %v2008_v10 = vld [vmem:[%s2476_s3 + $0x40] sm:$0xff] (!%p208_p9)   ;;  %vm1192_vm3 = vcmask (!%p208_p9), 1043456   ;;  %s239_s10 = sand.u32 (!%p208_p9), 1, %s2094_s19   ;;  %s1728_s12 = sshll.u32 (!%p208_p9), %s2158_s22, 7 }
  0x10   : > { %1800 = vmatpush3.bf16.msra.mxu1 (!%p208_p9), %v2001_v2  ;;  %1793 = vmatprep.subr.bf16.mxu0 (!%p208_p9), %v2104_v1  ;;  %v2009_v11 = vld [vmem:[%s2476_s3 + $0x50] sm:$0xff] (!%p208_p9)   ;;  %v2010_v12 = vld [vmem:[%s2476_s3 + $0x48] sm:$0xff] (!%p208_p9)   ;;  %v2011_v13 = vld [vmem:[%s2476_s3 + $0x58] sm:$0xff] (!%p208_p9)   ;;  %s1675_s11 = sshll.u32 (!%p208_p9), %s239_s10, 3  ;;  %s2430_s17 = scalar_lea.hbm (!%p208_p9), %s2478_s5, %s1728_s12 }
  0x11   : > { %1801 = vmatprep.subr.bf16.mxu1 (!%p208_p9), %v2104_v1  ;;  %1803 = vmatprep.mubr.msk.bf16.mxu1 (!%p208_p9), %vm2105_vm0, %v2104_v1  ;;  %v2012_v15 = vld [vmem:[%s2476_s3 + $0x60] sm:$0xff] (!%p208_p9)   ;;  %v2013_v16 = vld [vmem:[%s2476_s3 + $0x70] sm:$0xff] (!%p208_p9)   ;;  %v2014_v17 = vld [vmem:[%s2476_s3 + $0x68] sm:$0xff] (!%p208_p9)  }
  0x12   : > { %v2015_v18 = vld [vmem:[%s2476_s3 + $0x78] sm:$0xff] (!%p208_p9)   ;;  %v2016_v19 = vld [vmem:[%s2476_s3 + $0x80] sm:$0xff] (!%p208_p9)   ;;  %v2017_v20 = vld [vmem:[%s2476_s3 + $0x90] sm:$0xff] (!%p208_p9)  }
  0x13   : > { %1794 = vmatpush3.bf16.msra.mxu0 (!%p208_p9), %v2002_v3  ;;  %v2018_v21 = vld [vmem:[%s2476_s3 + $0x88] sm:$0xff] (!%p208_p9)   ;;  %v2019_v22 = vld [vmem:[%s2476_s3 + $0x98] sm:$0xff] (!%p208_p9)   ;;  %v2020_v24 = vld [vmem:[%s2476_s3 + $0xa0] sm:$0xff] (!%p208_p9)  }
  0x14   : > { %1802 = vmatpush3.bf16.msra.mxu1 (!%p208_p9), %v2003_v4  ;;  %1807 = vmatprep.subr.bf16.mxu0 (!%p208_p9), %v2104_v1  ;;  %v2021_v25 = vld [vmem:[%s2476_s3 + $0xb0] sm:$0xff] (!%p208_p9)   ;;  %v2022_v26 = vld [vmem:[%s2476_s3 + $0xa8] sm:$0xff] (!%p208_p9)   ;;  %v2023_v27 = vld [vmem:[%s2476_s3 + $0xb8] sm:$0xff] (!%p208_p9)  }
  0x15   : > { %s243_s13 = scalar_select %p242_p10, %s2158_s22, 1  ;;  %1815 = vmatprep.subr.bf16.mxu1 %v2104_v1 }
  0x16   : > { %s1575_s22 = scalar_lea.sflag [#allocation3], %s239_s10 }
  0x17   : > { %s2207_s14 = sshll.u32 %s243_s13, 2  ;;  %s241_s13 = scalar_lea.vmem [#allocation2], %s1675_s11 }
  0x18   : > { %s245_s25 = scalar_lea.vmem %s2473_s0, %s2207_s14  ;;  %s253_s9 = scalar_lea.vmem %s2475_s2, %s2207_s14 }
  0x19   : > { %v255_v7 = vld [vmem:[%s245_s25] sm:$0xf]  ;;  %s249_s25 = scalar_lea.vmem %s2474_s1, %s2207_s14  ;;  %s1588_s14 = sshll.u32 %s241_s13, 4  ;;  %s2432_s14 = int_to_ptr.vmem [resolvable:$true] %s1588_s14 }
  0x1a   : > { %1796 = vmatmul.mubr.msk.bf16.vlgmr.msra.gmra.mrb[0].mxu0 %vm318_vm1, %v255_v7  ;;  %1804 = vmatmul.mubr.msk.bf16.vlgmr.msra.gmra.mrb[0].mxu1 %vm318_vm1, %v255_v7  ;;  %v256_v14 = vld [vmem:[%s249_s25] sm:$0xf]  ;;  %s2040_s23 = scalar_lea.vmem %s2432_s14, 128  ;;  %s2106_s25 = smov [#allocation2]  }
  0x1b   : > { %1808 = vmatpush3.bf16.msra.mxu0 %v2004_v5  ;;  %1816 = vmatpush3.bf16.msra.mxu1 %v2005_v6  ;;  %v257_v23 = vld [vmem:[%s253_s9] sm:$0xf]  ;;  %p2041_p11 = scmp.ne.s32.totalorder %s2432_s14, %s2040_s23  ;;  %s2044_s26 = sshll.u32 %s2106_s25, 4  ;;  %s2045_s26 = int_to_ptr.vmem [resolvable:$false] %s2044_s26 }
  0x1c   : > { %1809 = vmatprep.subr.bf16.mxu0 %v2104_v1  ;;  %1817 = vmatprep.subr.bf16.mxu1 %v2104_v1  ;;  %s2046_s30 = scalar_lea.vmem %s2045_s26, 256  ;;  %p2047_p0 = scmp.lt.s32.totalorder %s2432_s14, %s2045_s26 }
  0x1d   : > { %1811 = vmatprep.mubr.msk.bf16.mxu0 %vm2105_vm0, %v2104_v1  ;;  %1819 = vmatprep.mubr.msk.bf16.mxu1 %vm2105_vm0, %v2104_v1  ;;  %p2042_p12 = pnand %p2041_p11, %p2175_p5  ;;  %p2048_p1 = scmp.lt.s32.totalorder %s2046_s30, %s2040_s23 }
  0x1f   : > { %1810 = vmatpush3.bf16.msra.mxu0 %v2006_v8  ;;  %1818 = vmatpush3.bf16.msra.mxu1 %v2007_v9  ;;  %p2043_p13 = pneg %p2042_p12  ;;  %p2049_p2 = por %p2048_p1, %p2047_p0 }
  0x20   : > { %1823 = vmatprep.subr.bf16.mxu0 %v2104_v1  ;;  %1831 = vmatprep.subr.bf16.mxu1 %v2104_v1 }
  0x21   : > { %p2050_p3 = pnand %p2049_p2, %p2043_p13 }
  0x22   : > { %1812 = vmatmul.mubr.msk.bf16.vlgmr.msra.gmra.mrb[4].mxu0 %vm318_vm1, %v255_v7  ;;  %1820 = vmatmul.mubr.msk.bf16.vlgmr.msra.gmra.mrb[4].mxu1 %vm318_vm1, %v255_v7 }
  0x23   : > { %1824 = vmatpush3.bf16.msra.mxu0 %v2008_v10  ;;  %1832 = vmatpush3.bf16.msra.mxu1 %v2009_v11 }
  0x24   : > { %1825 = vmatprep.subr.bf16.mxu0 %v2104_v1  ;;  %1833 = vmatprep.subr.bf16.mxu1 %v2104_v1 }
  0x25   : > { %1827 = vmatprep.mubr.msk.bf16.mxu0 %vm2105_vm0, %v2104_v1  ;;  %1835 = vmatprep.mubr.msk.bf16.mxu1 %vm2105_vm0, %v2104_v1 }
  0x27   : > { %1826 = vmatpush3.bf16.msra.mxu0 %v2010_v12  ;;  %1834 = vmatpush3.bf16.msra.mxu1 %v2011_v13 }
  0x28   : > { %1839 = vmatprep.subr.bf16.mxu0 %v2104_v1  ;;  %1847 = vmatprep.subr.bf16.mxu1 %v2104_v1 }
  0x2a   : > { %1828 = vmatmul.mubr.msk.bf16.vlgmr.msra.gmra.mrb[8].mxu0 %vm318_vm1, %v256_v14  ;;  %1836 = vmatmul.mubr.msk.bf16.vlgmr.msra.gmra.mrb[8].mxu1 %vm318_vm1, %v256_v14 }
  0x2b   : > { %1840 = vmatpush3.bf16.msra.mxu0 %v2012_v15  ;;  %1848 = vmatpush3.bf16.msra.mxu1 %v2013_v16 }
  0x2c   : > { %1841 = vmatprep.subr.bf16.mxu0 %v2104_v1  ;;  %1849 = vmatprep.subr.bf16.mxu1 %v2104_v1 }
  0x2d   : > { %1843 = vmatprep.mubr.msk.bf16.mxu0 %vm2105_vm0, %v2104_v1  ;;  %1851 = vmatprep.mubr.msk.bf16.mxu1 %vm2105_vm0, %v2104_v1 }
  0x2f   : > { %1842 = vmatpush3.bf16.msra.mxu0 %v2014_v17  ;;  %1850 = vmatpush3.bf16.msra.mxu1 %v2015_v18 }
  0x30   : > { %1855 = vmatprep.subr.bf16.mxu0 %v2104_v1  ;;  %1863 = vmatprep.subr.bf16.mxu1 %v2104_v1 }
  0x32   : > { %1844 = vmatmul.mubr.msk.bf16.vlgmr.msra.gmra.mrb[12].mxu0 %vm318_vm1, %v256_v14  ;;  %1852 = vmatmul.mubr.msk.bf16.vlgmr.msra.gmra.mrb[12].mxu1 %vm318_vm1, %v256_v14 }
  0x33   : > { %1856 = vmatpush3.bf16.msra.mxu0 %v2016_v19  ;;  %1864 = vmatpush3.bf16.msra.mxu1 %v2017_v20 }
  0x34   : > { %1857 = vmatprep.subr.bf16.mxu0 %v2104_v1  ;;  %1865 = vmatprep.subr.bf16.mxu1 %v2104_v1 }
  0x35   : > { %1859 = vmatprep.mubr.msk.bf16.mxu0 %vm2105_vm0, %v2104_v1  ;;  %1867 = vmatprep.mubr.msk.bf16.mxu1 %vm2105_vm0, %v2104_v1 }
  0x37   : > { %1858 = vmatpush3.bf16.msra.mxu0 %v2018_v21  ;;  %1866 = vmatpush3.bf16.msra.mxu1 %v2019_v22 }
  0x38   : > { %1871 = vmatprep.subr.bf16.mxu0 %v2104_v1  ;;  %1879 = vmatprep.subr.bf16.mxu1 %v2104_v1 }
  0x3a   : > { %1860 = vmatmul.mubr.msk.bf16.vlgmr.msra.gmra.mrb[16].mxu0 %vm318_vm1, %v257_v23  ;;  %1868 = vmatmul.mubr.msk.bf16.vlgmr.msra.gmra.mrb[16].mxu1 %vm318_vm1, %v257_v23 }
  0x3b   : > { %1872 = vmatpush3.bf16.msra.mxu0 %v2020_v24  ;;  %1875 = vmatprep.mubr.msk.bf16.mxu0 %vm2105_vm0, %v2104_v1 }
  0x3c   : > { %1873 = vmatprep.subr.bf16.mxu0 %v2104_v1  ;;  %1880 = vmatpush3.bf16.msra.mxu1 %v2021_v25 }
  0x3d   : > { %1883 = vmatprep.mubr.msk.bf16.mxu1 %vm2105_vm0, %v2104_v1  ;;  %1881 = vmatprep.subr.bf16.mxu1 %v2104_v1 }
  0x3f   : > { %1874 = vmatpush3.bf16.msra.mxu0 %v2022_v26 }
  0x40   : > { %1882 = vmatpush3.bf16.msra.mxu1 %v2023_v27  ;;  %1887 = vmatprep.subr.bf16.mxu0 %v2104_v1 }
  0x41   : > { %1893 = vmatprep.subr.bf16.mxu1 %v2104_v1 }
  0x42   : > { %1876 = vmatmul.mubr.msk.bf16.vlgmr.msra.gmra.mrb[20].mxu0 %vm318_vm1, %v257_v23 }
  0x43   : > { %1884 = vmatmul.mubr.msk.bf16.vlgmr.msra.gmra.mrb[20].mxu1 %vm318_vm1, %v257_v23  ;;  %1889 = vmatprep.mubr.msk.bf16.mxu0 %vm2105_vm0, %v2104_v1 }
  0x44   : > { %1895 = vmatprep.mubr.msk.bf16.mxu1 %vm2105_vm0, %v2104_v1 }
  0xed   : > { %v356_v28 = vpop.f32.mrb[0].mxu0  ;;  %v408_v30 = vpop.f32.mrb[0].mxu1 }
  0xee   : > { %v1797_v29 = vpop.f32.mrb[1].mxu0  ;;  %v1805_v32 = vpop.f32.mrb[1].mxu1  ;;  %v940_v56 = vmul.f32 0.35355338, %v356_v28  ;;  %v941_v57 = vmul.f32 0.35355338, %v408_v30 }
  0xef   : > { %v359_v31 = vpop.f32.mrb[2].mxu0  ;;  %v411_v34 = vpop.f32.mrb[2].mxu1 }
  0xf0   : > { %v1798_v33 = vpop.f32.mrb[3].mxu0  ;;  %v1806_v35 = vpop.f32.mrb[3].mxu1  ;;  %v944_v59 = vpack.c.bf16 %v940_v56, %v940_v56  ;;  %v945_v63 = vpack.c.bf16 %v941_v57, %v941_v57 }
  0xf5   : > { %v460_v36 = vpop.f32.mrb[4].mxu0  ;;  %v512_v38 = vpop.f32.mrb[4].mxu1 }
  0xf6   : > { %v1813_v37 = vpop.f32.mrb[5].mxu0  ;;  %v1821_v40 = vpop.f32.mrb[5].mxu1  ;;  %v942_v9 = vmul.f32 0.35355338, %v460_v36  ;;  %v943_v10 = vmul.f32 0.35355338, %v512_v38 }
  0xf7   : > { %v463_v39 = vpop.f32.mrb[6].mxu0  ;;  %v515_v42 = vpop.f32.mrb[6].mxu1 }
  0xf8   : > { %v1814_v41 = vpop.f32.mrb[7].mxu0  ;;  %v1822_v43 = vpop.f32.mrb[7].mxu1  ;;  %v946_v11 = vpack.c.bf16 %v942_v9, %v942_v9  ;;  %v947_v12 = vpack.c.bf16 %v943_v10, %v943_v10 }
  0xfd   : > { %v567_v44 = vpop.f32.mrb[8].mxu0  ;;  %v619_v46 = vpop.f32.mrb[8].mxu1 }
  0xfe   : > { %v948_v45 = vpack.c.bf16 %v567_v44, %v567_v44  ;;  %v1829_v47 = vpop.f32.mrb[9].mxu0  ;;  %v949_v48 = vpack.c.bf16 %v619_v46, %v619_v46  ;;  %v1837_v50 = vpop.f32.mrb[9].mxu1 }
  0xff   : > { %v570_v49 = vpop.f32.mrb[10].mxu0  ;;  %v622_v53 = vpop.f32.mrb[10].mxu1 }
 0x100   : > { %v957_v51 = vsel %vm952_vm2, %v948_v45, 0  ;;  %v1830_v52 = vpop.f32.mrb[11].mxu0  ;;  %v1003_v54 = vsel %vm952_vm2, %v949_v48, 0  ;;  %v1838_v55 = vpop.f32.mrb[11].mxu1 }
 0x101   : > { %1888 = vmatpush3.bf16.xpose.msra.mxu0 %v957_v51  ;;  %1894 = vmatpush3.bf16.xpose.msra.mxu1 %v1003_v54 }
 0x102   : > { %1899 = vmatprep.subr.bf16.mxu0 %v2104_v1  ;;  %1905 = vmatprep.subr.bf16.mxu1 %v2104_v1 }
 0x105   : > { %v671_v58 = vpop.f32.mrb[12].mxu0  ;;  %v723_v61 = vpop.f32.mrb[12].mxu1 }
 0x106   : > { %v950_v60 = vpack.c.bf16 %v671_v58, %v671_v58  ;;  %v1845_v62 = vpop.f32.mrb[13].mxu0  ;;  %v951_v0 = vpack.c.bf16 %v723_v61, %v723_v61  ;;  %v1853_v3 = vpop.f32.mrb[13].mxu1 }
 0x107   : > { %v674_v2 = vpop.f32.mrb[14].mxu0  ;;  %v726_v6 = vpop.f32.mrb[14].mxu1 }
 0x108   : > { %v1049_v4 = vsel %vm952_vm2, %v950_v60, 0  ;;  %v1846_v5 = vpop.f32.mrb[15].mxu0  ;;  %1890 = vmatmul.mubr.msk.bf16.vlgmr.msra.gmra.mrb[24].mxu0 %vm952_vm2, %v944_v59  ;;  %v1095_v7 = vsel %vm952_vm2, %v951_v0, 0  ;;  %1896 = vmatmul.mubr.msk.bf16.vlgmr.msra.gmra.mrb[24].mxu1 %vm952_vm2, %v945_v63  ;;  %v1854_v8 = vpop.f32.mrb[15].mxu1 }
 0x109   : > { %1900 = vmatpush3.bf16.xpose.msra.mxu0 %v1049_v4  ;;  %1906 = vmatpush3.bf16.xpose.msra.mxu1 %v1095_v7 }
 0x10a   : > { %1901 = vmatprep.mubr.msk.bf16.mxu0 %vm2105_vm0, %v2104_v1  ;;  %1907 = vmatprep.mubr.msk.bf16.mxu1 %vm2105_vm0, %v2104_v1 }
 0x10b   : > { %1911 = vmatprep.subr.bf16.mxu0 %v2104_v1  ;;  %1917 = vmatprep.subr.bf16.mxu1 %v2104_v1 }
 0x10d   : > { %v778_v13 = vpop.f32.mrb[16].mxu0  ;;  %v830_v17 = vpop.f32.mrb[16].mxu1 }
 0x10e   : > { %v1185_v14 = vpack.c.bf16 %v778_v13, %v778_v13  ;;  %v1861_v15 = vpop.f32.mrb[17].mxu0  ;;  %v1186_v20 = vpack.c.bf16 %v830_v17, %v830_v17  ;;  %v1869_v21 = vpop.f32.mrb[17].mxu1 }
 0x10f   : > { %v781_v16 = vpop.f32.mrb[18].mxu0  ;;  %v833_v22 = vpop.f32.mrb[18].mxu1 }
 0x110   : > { %1902 = vmatmul.mubr.msk.bf16.vlgmr.msra.gmra.mrb[28].mxu0 %vm952_vm2, %v946_v11  ;;  %1908 = vmatmul.mubr.msk.bf16.vlgmr.msra.gmra.mrb[28].mxu1 %vm952_vm2, %v947_v12  ;;  %v1194_v18 = vsel %vm1192_vm3, %v1185_v14, 0  ;;  %v1862_v19 = vpop.f32.mrb[19].mxu0  ;;  %v1240_v23 = vsel %vm1192_vm3, %v1186_v20, 0  ;;  %v1870_v24 = vpop.f32.mrb[19].mxu1 }
 0x111   : > { %1913 = vmatprep.mubr.msk.bf16.mxu0 %vm2105_vm0, %v2104_v1  ;;  %1919 = vmatprep.mubr.msk.bf16.mxu1 %vm2105_vm0, %v2104_v1  ;;  %v1378_v24 = vld [vmem:[%s2477_s4] sm:$0xf] }
 0x112   : > { %1912 = vmatpush3.bf16.msra.mxu0 %v1194_v18  ;;  %1918 = vmatpush3.bf16.msra.mxu1 %v1240_v23 }
 0x113   : > { %1923 = vmatprep.subr.bf16.mxu0 %v2104_v1  ;;  %1929 = vmatprep.subr.bf16.mxu1 %v2104_v1 }
 0x115   : > { %v2363_v25 = vpop.f32.mrb[20].mxu0 }
 0x116   : > { %v2365_v26 = vpop.f32.mrb[20].mxu1  ;;  %v1877_v27 = vpop.f32.mrb[21].mxu0  ;;  %v1187_v14 = vpack.c.bf16 %v2363_v25, %v2363_v25 }
 0x117   : > { %v1885_v28 = vpop.f32.mrb[21].mxu1  ;;  %v885_v29 = vpop.f32.mrb[22].mxu0  ;;  %v1188_v20 = vpack.c.bf16 %v2365_v26, %v2365_v26 }
 0x118   : > { %v937_v30 = vpop.f32.mrb[22].mxu1  ;;  %v1878_v31 = vpop.f32.mrb[23].mxu0  ;;  %v1286_v19 = vsel %vm1192_vm3, %v1187_v14, 0  ;;  %v1386_v28 = vsel %vm1192_vm3, %v1378_v24, 0 }
 0x119   : > { %v1886_v32 = vpop.f32.mrb[23].mxu1  ;;  %v1332_v25 = vsel %vm1192_vm3, %v1188_v20, 0 }
 0x11a   : > { %v1379_v32 = vld [vmem:[%s2477_s4 + $0x4] sm:$0xf] }
 0x1db   : > { %v993_v33 = vpop.f32.mrb[24].mxu0  ;;  %v1039_v34 = vpop.f32.mrb[24].mxu1 }
 0x1dc   : > { %v1891_v35 = vpop.f32.mrb[25].mxu0  ;;  %v1137_v36 = vsel %vm952_vm2, %v993_v33, -inf  ;;  %v1897_v37 = vpop.f32.mrb[25].mxu1  ;;  %v1140_v42 = vsel %vm952_vm2, %v1039_v34, -inf }
 0x1dd   : > { %1138 = vmax.xlane.f32.xlu0 %v1137_v36  ;;  %v996_v38 = vpop.f32.mrb[26].mxu0  ;;  %v1042_v39 = vpop.f32.mrb[26].mxu1 }
 0x1de   : > { %v1892_v40 = vpop.f32.mrb[27].mxu0  ;;  %v1898_v41 = vpop.f32.mrb[27].mxu1 }
 0x1df   : > { %v1381_v40 = vld [vmem:[%s2477_s4 + $0xc] sm:$0xf] }
 0x1e1   : > { %1141 = vmax.xlane.f32.xlu0 %v1140_v42 }
 0x1e3   : > { %v1085_v43 = vpop.f32.mrb[28].mxu0  ;;  %v1131_v44 = vpop.f32.mrb[28].mxu1 }
 0x1e4   : > { %v1903_v45 = vpop.f32.mrb[29].mxu0  ;;  %v1143_v46 = vsel %vm952_vm2, %v1085_v43, -inf  ;;  %v1909_v47 = vpop.f32.mrb[29].mxu1  ;;  %v1146_v52 = vsel %vm952_vm2, %v1131_v44, -inf }
 0x1e5   : > { %1144 = vmax.xlane.f32.xlu1 %v1143_v46  ;;  %v1088_v48 = vpop.f32.mrb[30].mxu0  ;;  %v1134_v49 = vpop.f32.mrb[30].mxu1  ;;  %v1524_v45 = vsel %vm1192_vm3, %v1381_v40, 0 }
 0x1e6   : > { %v1904_v50 = vpop.f32.mrb[31].mxu0  ;;  %v1910_v51 = vpop.f32.mrb[31].mxu1 }
 0x1e9   : > { %1147 = vmax.xlane.f32.xlu1 %v1146_v52 }
 0x26a   : > { %v1139_v53 = vpop.xlane.xlu0 %1138 }
 0x26b   : > { %v1149_v54 = vsub.f32 %v993_v33, %v1139_v53  ;;  %v1432_v33 = vsel %vm1192_vm3, %v1379_v32, 0 }
 0x26d   : > { %v1153_v55 = vmul.f32 1.442695, %v1149_v54 }
 0x26e   : > { %v1142_v56 = vpop.xlane.xlu0 %1141 }
 0x26f   : > { %2024 = vpow2.f32 %v1153_v55  ;;  %v1150_v57 = vsub.f32 %v1039_v34, %v1142_v56  ;;  %v1380_v34 = vld [vmem:[%s2477_s4 + $0x8] sm:$0xf] }
 0x270   : > { %v1478_v38 = vsel %vm1192_vm3, %v1380_v34, 0 }
 0x271   : > { %v1155_v58 = vmul.f32 1.442695, %v1150_v57 }
 0x272   : > { %v1145_v59 = vpop.xlane.xlu1 %1144 }
 0x273   : > { %2026 = vpow2.f32 %v1155_v58  ;;  %v1151_v60 = vsub.f32 %v1085_v43, %v1145_v59 }
 0x275   : > { %v1157_v61 = vmul.f32 1.442695, %v1151_v60 }
 0x276   : > { %v1148_v62 = vpop.xlane.xlu1 %1147 }
 0x277   : > { %2028 = vpow2.f32 %v1157_v61  ;;  %v1152_v63 = vsub.f32 %v1131_v44, %v1148_v62 }
 0x279   : > { %v2025_v0 = vpop.eup %2024  ;;  %v1159_v2 = vmul.f32 1.442695, %v1152_v63 }
 0x27a   : > { %v1161_v3 = vsel %vm952_vm2, %v2025_v0, 0.0 }
 0x27b   : > { %2030 = vpow2.f32 %v1159_v2  ;;  %1162 = vadd.xlane.f32.xlu0 %v1161_v3 }
 0x27d   : > { %v2027_v4 = vpop.eup %2026 }
 0x27e   : > { %v1164_v5 = vsel %vm952_vm2, %v2027_v4, 0.0 }
 0x27f   : > { %1165 = vadd.xlane.f32.xlu1 %v1164_v5 }
 0x281   : > { %v2029_v6 = vpop.eup %2028 }
 0x282   : > { %v1167_v7 = vsel %vm952_vm2, %v2029_v6, 0.0 }
 0x283   : > { %1168 = vadd.xlane.f32.xlu0 %v1167_v7 }
 0x285   : > { %v2031_v8 = vpop.eup %2030 }
 0x286   : > { %v1170_v9 = vsel %vm952_vm2, %v2031_v8, 0.0 }
 0x287   : > { %1171 = vadd.xlane.f32.xlu1 %v1170_v9 }
 0x308   : > { %v1163_v10 = vpop.xlane.xlu0 %1162 }
 0x309   : > { %2032 = vrcp.f32 %v1163_v10 }
 0x30c   : > { %v1166_v11 = vpop.xlane.xlu1 %1165 }
 0x30d   : > { %2034 = vrcp.f32 %v1166_v11 }
 0x310   : > { %v1169_v12 = vpop.xlane.xlu0 %1168 }
 0x311   : > { %2036 = vrcp.f32 %v1169_v12 }
 0x313   : > { %v2033_v13 = vpop.eup %2032 }
 0x314   : > { %v1177_v15 = vmul.f32 %v2033_v13, %v2025_v0  ;;  %v1172_v16 = vpop.xlane.xlu1 %1171 }
 0x315   : > { %2038 = vrcp.f32 %v1172_v16 }
 0x316   : > { %v1181_v17 = vpack.c.bf16 %v1177_v15, %v1177_v15 }
 0x317   : > { %v2035_v18 = vpop.eup %2034 }
 0x318   : > { %v1178_v21 = vmul.f32 %v2035_v18, %v2027_v4  ;;  %1914 = vmatmul.mubr.msk.bf16.vlgmr.msra.gmra.mrb[32].mxu0 %vm952_vm2, %v1181_v17 }
 0x319   : > { %1924 = vmatpush3.bf16.msra.mxu0 %v1286_v19  ;;  %1925 = vmatprep.mubr.msk.bf16.mxu0 %vm2105_vm0, %v2104_v1 }
 0x31a   : > { %v1182_v22 = vpack.c.bf16 %v1178_v21, %v1178_v21  ;;  %1935 = vmatprep.subr.bf16.mxu0 %v2104_v1 }
 0x31b   : > { %v2037_v23 = vpop.eup %2036 }
 0x31c   : > { %v1179_v27 = vmul.f32 %v2037_v23, %v2029_v6  ;;  %1920 = vmatmul.mubr.msk.bf16.vlgmr.msra.gmra.mrb[32].mxu1 %vm952_vm2, %v1182_v22 }
 0x31d   : > { %1930 = vmatpush3.bf16.msra.mxu1 %v1332_v25  ;;  %1931 = vmatprep.mubr.msk.bf16.mxu1 %vm2105_vm0, %v2104_v1 }
 0x31e   : > { %v1183_v26 = vpack.c.bf16 %v1179_v27, %v1179_v27  ;;  %1941 = vmatprep.subr.bf16.mxu1 %v2104_v1 }
 0x31f   : > { %v2039_v29 = vpop.eup %2038 }
 0x320   : > { %v1180_v30 = vmul.f32 %v2039_v29, %v2031_v8  ;;  %1926 = vmatmul.mubr.msk.bf16.vlgmr.msra.gmra.mrb[36].mxu0 %vm952_vm2, %v1183_v26 }
 0x321   : > { %1936 = vmatpush3.bf16.msra.mxu0 %v1386_v28  ;;  %1937 = vmatprep.mubr.msk.bf16.mxu0 %vm2105_vm0, %v2104_v1 }
 0x322   : > { %v1184_v31 = vpack.c.bf16 %v1180_v30, %v1180_v30  ;;  %1947 = vmatprep.subr.bf16.mxu0 %v2104_v1 }
 0x324   : > { %1932 = vmatmul.mubr.msk.bf16.vlgmr.msra.gmra.mrb[36].mxu1 %vm952_vm2, %v1184_v31 }
 0x325   : > { %1943 = vmatprep.mubr.msk.bf16.mxu1 %vm2105_vm0, %v2104_v1  ;;  %1942 = vmatpush3.bf16.msra.mxu1 %v1432_v33 }
 0x326   : > { %1953 = vmatprep.subr.bf16.mxu1 %v2104_v1 }
 0x3eb   : > { %v1230_v35 = vpop.f32.mrb[32].mxu0 }
 0x3ec   : > { %v1374_v36 = vpack.c.bf16 %v1230_v35, %v1230_v35  ;;  %v1915_v37 = vpop.f32.mrb[33].mxu0 }
 0x3ed   : > { %v1233_v39 = vpop.f32.mrb[34].mxu0 }
 0x3ee   : > { %v1916_v41 = vpop.f32.mrb[35].mxu0  ;;  %1938 = vmatmul.mubr.msk.bf16.vlgmr.msra.gmra.mrb[40].mxu0 %vm952_vm2, %v1374_v36 }
 0x3ef   : > { %v1276_v42 = vpop.f32.mrb[32].mxu1  ;;  %1948 = vmatpush3.bf16.msra.mxu0 %v1478_v38  ;;  %1949 = vmatprep.mubr.msk.bf16.mxu0 %vm2105_vm0, %v2104_v1 }
 0x3f0   : > { %v1375_v43 = vpack.c.bf16 %v1276_v42, %v1276_v42  ;;  %v1921_v44 = vpop.f32.mrb[33].mxu1 }
 0x3f1   : > { %v1279_v46 = vpop.f32.mrb[34].mxu1 }
 0x3f2   : > { %v1922_v47 = vpop.f32.mrb[35].mxu1  ;;  %1944 = vmatmul.mubr.msk.bf16.vlgmr.msra.gmra.mrb[40].mxu1 %vm952_vm2, %v1375_v43 }
 0x3f3   : > { %v1322_v48 = vpop.f32.mrb[36].mxu0  ;;  %1954 = vmatpush3.bf16.msra.mxu1 %v1524_v45  ;;  %1955 = vmatprep.mubr.msk.bf16.mxu1 %vm2105_vm0, %v2104_v1 }
 0x3f4   : > { %v1376_v49 = vpack.c.bf16 %v1322_v48, %v1322_v48  ;;  %v1927_v50 = vpop.f32.mrb[37].mxu0 }
 0x3f5   : > { %v1325_v51 = vpop.f32.mrb[38].mxu0 }
 0x3f6   : > { %v1928_v52 = vpop.f32.mrb[39].mxu0  ;;  %1950 = vmatmul.mubr.msk.bf16.vlgmr.msra.gmra.mrb[44].mxu0 %vm952_vm2, %v1376_v49 }
 0x3f7   : > { %v1368_v53 = vpop.f32.mrb[36].mxu1 }
 0x3f8   : > { %v1377_v54 = vpack.c.bf16 %v1368_v53, %v1368_v53  ;;  %v1933_v55 = vpop.f32.mrb[37].mxu1 }
 0x3f9   : > { %v1371_v56 = vpop.f32.mrb[38].mxu1 }
 0x3fa   : > { %v1934_v57 = vpop.f32.mrb[39].mxu1  ;;  %1956 = vmatmul.mubr.msk.bf16.vlgmr.msra.gmra.mrb[44].mxu1 %vm952_vm2, %v1377_v54 }
 0x4c1   : > { %v1422_v58 = vpop.f32.mrb[40].mxu0 }
 0x4c2   : > { %v1939_v59 = vpop.f32.mrb[41].mxu0  ;;  %v1566_v62 = vsel %vm318_vm1, %v1422_v58, 0.0 }
 0x4c3   : > { %v1425_v60 = vpop.f32.mrb[42].mxu0 }
 0x4c4   : > { %v1940_v61 = vpop.f32.mrb[43].mxu0 }
 0x4c5   : > { %v1468_v1 = vpop.f32.mrb[40].mxu1 }
 0x4c6   : > { %v1567_v63 = vsel %vm318_vm1, %v1468_v1, 0.0  ;;  %v1945_v0 = vpop.f32.mrb[41].mxu1 }
 0x4c7   : > { %v1568_v2 = vadd.f32 %v1567_v63, %v1566_v62  ;;  %v1471_v3 = vpop.f32.mrb[42].mxu1 }
 0x4c8   : > { %v1946_v4 = vpop.f32.mrb[43].mxu1 }
 0x4c9   : > { %v1514_v5 = vpop.f32.mrb[44].mxu0 }
 0x4ca   : > { %v1569_v6 = vsel %vm318_vm1, %v1514_v5, 0.0  ;;  %v1951_v7 = vpop.f32.mrb[45].mxu0 }
 0x4cb   : > { %v1570_v8 = vadd.f32 %v1569_v6, %v1568_v2  ;;  %v1517_v9 = vpop.f32.mrb[46].mxu0 }
 0x4cc   : > { %v1952_v10 = vpop.f32.mrb[47].mxu0 }
 0x4cd   : > { %v1560_v11 = vpop.f32.mrb[44].mxu1 }
 0x4ce   : > { %v1571_v12 = vsel %vm318_vm1, %v1560_v11, 0.0  ;;  %v1957_v13 = vpop.f32.mrb[45].mxu1 }
 0x4cf   : > { %v1572_v14 = vadd.f32 %v1571_v12, %v1570_v8  ;;  %v1563_v15 = vpop.f32.mrb[46].mxu1 }
 0x4d0   : > { %v1958_v16 = vpop.f32.mrb[47].mxu1 }
 0x4d1   : > { %1573 = vst.msk [vmem:[%s241_s13] sm:$0xff] %vm318_vm1, %v1572_v14 }
 0x4d2   : > { %2053 = shalt.err (!%p2050_p3)
}
 0x4d3   : > { %s2054_s6 = scalar_lea.hbm %s2430_s17, 128  ;;  %s2058_s9 = scalar_lea.hbm %s2478_s5, 256 }
 0x4d4   : > { %p2055_p4 = scmp.ne.s32.totalorder %s2430_s17, %s2054_s6  ;;  %p2059_p9 = scmp.lt.u32.totalorder %s2430_s17, %s2478_s5 }
 0x4d5   : > { %p2060_p10 = scmp.lt.u32.totalorder %s2058_s9, %s2054_s6  ;;  %p2062_p12 = scmp.lt.u32.totalorder %s2054_s6, %s2430_s17 }
 0x4d6   : > { %p2056_p7 = pnand %p2055_p4, %p2175_p5 }
 0x4d7   : > { %p2061_p11 = por %p2060_p10, %p2059_p9 }
 0x4d8   : > { %p2057_p8 = pneg %p2056_p7 }
 0x4d9   : > { %p2063_p13 = por %p2062_p12, %p2061_p11 }
 0x4db   : > { %p2064_p0 = pnand %p2063_p13, %p2057_p8 }
 0x4dd   : > { %2067 = shalt.err (!%p2064_p0)
}
 0x4de   : > { %1959 = dma.vmem_to_hbm [thread:$0]  (%p2175_p5), %s2432_s14, 128, %s2430_s17, %s1575_s22  }
 0x4df PF: > { %p1965_p1 = scmp.ge.s32.totalorder %s2102_s21, 2  ;;  %s1600_s12 = sand.u32 1, %s2090_s18  }
 0x4e0   : > { %s1601_s13 = scalar_lea.sflag [#allocation3], %s1600_s12 }
 0x4e1   : > { %p1962_p2 = pnand %p1965_p1, %p2179_p6 }
 0x4e3   : > { %2085 = dma.done.wait (!%p1962_p2), %s1601_s13, 128  }
 0x4e4   : > { %2087 = vsyncadd (!%p1962_p2), %s1601_s13, 4294967168  ;;  %p15_p3 = scmp.ge.s32.totalorder %s2162_s24, 4   ;;  %s2481_s18 = smov %s2094_s19 }
 0x4e5   : > { %s2482_s19 = smov %s2098_s20  ;;  %s2483_s20 = smov %s2173_s27 }
 0x4e6   : > { %s2484_s21 = smov %s2162_s24  ;;  %17 = sbr.rel (!%p15_p3) target bundleno = 3 (0x3), region = 81 }
 0x4ed   :  { %1606 = vsyncpa [#allocation3], 1 }
 0x4ee   :  { %1608 = vsyncpa [#allocation3 + $0x1], 1 }

</bundles_post_ra>
